<compile_context>
chip_gen: v6e
topology: v6e:2x2x1
jax: 0.10.0
libtpu: 0.0.40
codegen_flags: <defaults>
</compile_context>

<pallas_src>
import functools

import jax
import jax.numpy as jnp
from jax.experimental import pallas as pl
from jax.experimental.pallas import tpu as pltpu

_LANE = 128          # TPU vreg lane width
_TARGET_LANES = 512  # target lane-dense width for the row-packing path


def _minmax_kernel(x_ref, scale_ref, min_ref, o_ref, *, clip: bool,
                   lo: float, hi: float):
    # x_ref: (bb, bf); scale_ref/min_ref: (1, bf) f32, broadcast over rows.
    y = x_ref[...].astype(jnp.float32) * scale_ref[...] + min_ref[...]
    if clip:  # compile-time flag (self.clip); bounds baked as Python floats
        y = jnp.minimum(jnp.maximum(y, lo), hi)
    o_ref[...] = y.astype(o_ref.dtype)


def _round_up(a: int, b: int) -> int:
    return ((a + b - 1) // b) * b


def minmax_scaler_transform(x, scale, min_, feature_range, clip: bool, *,
                            block_batch: int = 2048, block_feat: int = 512):
    """Pallas implementation of TorchMinMaxScaler.transform.

    x:             (..., F) float array (leading dims are flattened, zero-copy)
    scale, min_:   (F,)     float arrays (kept in f32 inside the kernel)
    feature_range: length-2 sequence / concrete array of clip bounds
    clip:          python bool (compile-time)
    """
    orig_shape = x.shape
    f = orig_shape[-1]
    x2 = x.reshape(-1, f)              # zero-copy row-major flatten
    n = x2.shape[0]
    dtype = x.dtype
    itemsize = jnp.dtype(dtype).itemsize

    # Scaler parameters in f32 (matches PyTorch precision for bf16/fp8 inputs).
    scale_f = scale.astype(jnp.float32)
    min_f = min_.astype(jnp.float32)

    # Fitted constants -> bake into the kernel (drops the SMEM input entirely).
    lo = float(feature_range[0])
    hi = float(feature_range[1])

    # ---- optional zero-copy row packing for tiny power-of-two F -------------
    # (N, F) -> (N/pack, F*pack) makes the lane axis 512 wide -> unmasked
    # full-width vector stores.  Only taken when the reshape is free.
    pack = 1
    if f < _LANE and _LANE % f == 0:
        cand = _TARGET_LANES // f
        if cand > 1 and n % cand == 0:
            pack = cand

    if pack > 1:
        n_rows = n // pack
        f_work = f * pack                       # multiple of 128
        x_w = x2.reshape(n_rows, f_work)        # zero-copy
        scale_w = jnp.tile(scale_f, (pack,))    # tiny (f_work,) arrays
        min_w = jnp.tile(min_f, (pack,))
    else:
        n_rows, f_work = n, f
        x_w = x2
        scale_w, min_w = scale_f, min_f

    # ---- tile sizes ----------------------------------------------------------
    # Feature block: lane-aligned, never over-padded; ragged edges are masked
    # by Pallas at the grid boundary.
    bf = min(_round_up(f_work, _LANE), block_feat)
    # Sublane rounding is dtype-aware (packed sub-32-bit dtypes need 16/32).
    sub = {4: 8, 2: 16, 1: 32}.get(itemsize, 8)
    # Guarantee >=2 row blocks when possible so both v7x TensorCores get work.
    bb = min(block_batch, _round_up(max(pl.cdiv(n_rows, 2), 1), sub))

    grid = (pl.cdiv(n_rows, bb), pl.cdiv(f_work, bf))

    scale2d = scale_w.reshape(1, f_work)
    min2d = min_w.reshape(1, f_work)

    # VMEM budget: double-buffered x tile + out tile + f32 param rows + slack;
    # capped at 48 MiB so the same tiling fits v5e/v6e (128 MiB) and v7x (64).
    tile_bytes = bb * bf * itemsize
    need = 2 * (tile_bytes + tile_bytes) + 8 * bf * 4 + (2 << 20)
    vmem_limit = int(min(max(2 * need, 32 << 20), 48 << 20))

    kernel = functools.partial(_minmax_kernel, clip=bool(clip), lo=lo, hi=hi)

    out_w = pl.pallas_call(
        kernel,
        out_shape=jax.ShapeDtypeStruct((n_rows, f_work), dtype),
        grid=grid,
        in_specs=[
            # x: tile over rows and features (edge blocks auto-masked)
            pl.BlockSpec((bb, bf), lambda i, j: (i, j)),
            # scale / min: same (1, bf) f32 block for every row-block
            pl.BlockSpec((1, bf), lambda i, j: (0, j)),
            pl.BlockSpec((1, bf), lambda i, j: (0, j)),
        ],
        out_specs=pl.BlockSpec((bb, bf), lambda i, j: (i, j)),
        compiler_params=pltpu.CompilerParams(
            dimension_semantics=("parallel", "parallel"),
            vmem_limit_bytes=vmem_limit,
        ),
    )(x_w, scale2d, min2d)

    # Undo packing / flattening (both reshapes are zero-copy).
    return out_w.reshape(orig_shape)


def minmax_scaler_transform_ref(x, scale, min_, feature_range, clip: bool):
    y = x * scale + min_
    if clip:
        y = jnp.minimum(jnp.maximum(y, float(feature_range[0])),
                        float(feature_range[1]))
    return y.astype(x.dtype)


if __name__ == "__main__":
    key = jax.random.PRNGKey(0)
    k_x, k_s, k_m, k_x2, k_s2, k_m2, k_x3, k_s3, k_m3 = jax.random.split(key, 9)

    feature_range = (0.0, 1.0)

    # Case 1: small power-of-two feature count -> zero-copy row-packing path.
    N, F = 16, 32
    x = jax.random.normal(k_x, (N, F), dtype=jnp.float32) * 3.0
    scale = jax.random.uniform(k_s, (F,), dtype=jnp.float32,
                               minval=0.1, maxval=1.0)
    min_ = jax.random.normal(k_m, (F,), dtype=jnp.float32) * 0.5

    out = jax.block_until_ready(
        minmax_scaler_transform(x, scale, min_, feature_range, clip=True))
    ref = minmax_scaler_transform_ref(x, scale, min_, feature_range, clip=True)
    assert out.shape == ref.shape and out.dtype == ref.dtype
    assert jnp.allclose(out, ref, atol=1e-6, rtol=1e-6)

    # Case 2: ragged batch, F not a multiple of 128 -> edge-masked blocks,
    # clip=False.  No wrapper pads / slices anywhere.
    N2, F2 = 300, 200
    x2 = jax.random.normal(k_x2, (N2, F2), dtype=jnp.float32) * 2.0
    scale2 = jax.random.uniform(k_s2, (F2,), dtype=jnp.float32,
                                minval=0.1, maxval=1.0)
    min2 = jax.random.normal(k_m2, (F2,), dtype=jnp.float32) * 0.5

    out2 = jax.block_until_ready(
        minmax_scaler_transform(x2, scale2, min2, feature_range, clip=False))
    ref2 = minmax_scaler_transform_ref(x2, scale2, min2, feature_range,
                                       clip=False)
    assert out2.shape == ref2.shape and out2.dtype == ref2.dtype
    assert jnp.allclose(out2, ref2, atol=1e-6, rtol=1e-6)

    # Case 3: >2D input (leading dims flattened, zero-copy), clip=True.
    B3, T3, F3 = 2, 4, 16
    x3 = jax.random.normal(k_x3, (B3, T3, F3), dtype=jnp.float32)
    scale3 = jax.random.uniform(k_s3, (F3,), dtype=jnp.float32,
                                minval=0.1, maxval=1.0)
    min3 = jax.random.normal(k_m3, (F3,), dtype=jnp.float32) * 0.5

    out3 = jax.block_until_ready(
        minmax_scaler_transform(x3, scale3, min3, feature_range, clip=True))
    ref3 = minmax_scaler_transform_ref(x3, scale3, min3, feature_range,
                                       clip=True)
    assert out3.shape == ref3.shape and out3.dtype == ref3.dtype
    assert jnp.allclose(out3, ref3, atol=1e-6, rtol=1e-6)

    print("KERNEL_OK")
</pallas_src>

<mosaic_0001>
module attributes {stable_mosaic.version = 11 : i64} {
  func.func @_minmax_kernel(%arg0: i32, %arg1: i32, %arg2: memref<8x512xf32, #tpu.memory_space<vmem>>, %arg3: memref<1x512xf32, #tpu.memory_space<vmem>>, %arg4: memref<1x512xf32, #tpu.memory_space<vmem>>, %arg5: memref<8x512xf32, #tpu.memory_space<vmem>>) attributes {dimension_semantics = [#tpu.dimension_semantics<parallel>, #tpu.dimension_semantics<parallel>], iteration_bounds = array<i64: 1, 1>, scalar_prefetch = 0 : i64, scratch_operands = 0 : i64, tpu.core_type = #tpu.core_type<tc>, window_params = [{transform_indices = @transform_0, window_bounds = array<i64: 8, 512>}, {transform_indices = @transform_1, window_bounds = array<i64: 1, 512>}, {transform_indices = @transform_2, window_bounds = array<i64: 1, 512>}, {transform_indices = @transform_3, window_bounds = array<i64: 8, 512>}]} {
    %c0 = arith.constant 0 : index
    %c0_0 = arith.constant 0 : index
    %0 = vector.load %arg2[%c0, %c0_0] : memref<8x512xf32, #tpu.memory_space<vmem>>, vector<8x512xf32>
    %c0_1 = arith.constant 0 : index
    %c0_2 = arith.constant 0 : index
    %1 = vector.load %arg3[%c0_1, %c0_2] : memref<1x512xf32, #tpu.memory_space<vmem>>, vector<1x512xf32>
    %2 = vector.broadcast %1 : vector<1x512xf32> to vector<8x512xf32>
    %3 = arith.mulf %0, %2 : vector<8x512xf32>
    %c0_3 = arith.constant 0 : index
    %c0_4 = arith.constant 0 : index
    %4 = vector.load %arg4[%c0_3, %c0_4] : memref<1x512xf32, #tpu.memory_space<vmem>>, vector<1x512xf32>
    %5 = vector.broadcast %4 : vector<1x512xf32> to vector<8x512xf32>
    %6 = arith.addf %3, %5 : vector<8x512xf32>
    %cst = arith.constant 0.000000e+00 : f32
    %7 = vector.broadcast %cst : f32 to vector<8x512xf32>
    %8 = arith.maximumf %6, %7 : vector<8x512xf32>
    %cst_5 = arith.constant 1.000000e+00 : f32
    %9 = vector.broadcast %cst_5 : f32 to vector<8x512xf32>
    %10 = arith.minimumf %8, %9 : vector<8x512xf32>
    %c0_6 = arith.constant 0 : index
    %c0_7 = arith.constant 0 : index
    %11 = vector.load %arg5[%c0_6, %c0_7] : memref<8x512xf32, #tpu.memory_space<vmem>>, vector<8x512xf32>
    tpu.vector_store %arg5[%c0_6, %c0_7], %10 {strides = array<i32>} : memref<8x512xf32, #tpu.memory_space<vmem>>, vector<8x512xf32>,
    return
  }
  func.func @transform_0(%arg0: i32, %arg1: i32) -> (i32, i32) {
    %c0_i32 = arith.constant 0 : i32
    return %arg0, %arg1 : i32, i32
  }
  func.func @transform_1(%arg0: i32, %arg1: i32) -> (i32, i32) {
    %c0_i32 = arith.constant 0 : i32
    %c0_i32_0 = arith.constant 0 : i32
    return %c0_i32, %arg1 : i32, i32
  }
  func.func @transform_2(%arg0: i32, %arg1: i32) -> (i32, i32) {
    %c0_i32 = arith.constant 0 : i32
    %c0_i32_0 = arith.constant 0 : i32
    return %c0_i32, %arg1 : i32, i32
  }
  func.func @transform_3(%arg0: i32, %arg1: i32) -> (i32, i32) {
    %c0_i32 = arith.constant 0 : i32
    return %arg0, %arg1 : i32, i32
  }
}

</mosaic_0001>

<bundles_post_ra>
// kernel: tpu_custom_call.1
= control target key start
LH: loop header
LB: loop body
LE: loop exit
PB: predicated region body
PF: predicated region fallthrough
CT: control target
= control target key end

     0   :  { %8 = vsyncpa [#allocation3], 0  ;;  %s468_s0 = inlined_call_operand.hbm [shape: f32[1,512], index: 0, kind: input, shape index: {}]   ;;  %s469_s1 = inlined_call_operand.hbm [shape: f32[1,512], index: 1, kind: input, shape index: {}]   ;;  %s470_s2 = inlined_call_operand.hbm [shape: f32[1,512], index: 2, kind: input, shape index: {}]   ;;  %s471_s3 = inlined_call_operand.hbm [shape: f32[1,512], index: 3, kind: output, shape index: {}]  }
   0x1   :  { %9 = vsyncpa [#allocation6], 0 }
   0x2   :  { %10 = vsyncpa [#allocation4], 0 }
   0x3   :  { %15 = vsyncadd [#allocation3], 448  ;;  %s403_s12 = smov [#allocation5]   ;;  %s404_s14 = smov [#allocation2]  }
   0x4   :  { %s29_s13 = sshll.u32 %s403_s12, 4  ;;  %s16_s15 = sshll.u32 %s404_s14, 4  ;;  %s30_s13 = int_to_ptr.vmem [resolvable:$true] %s29_s13  ;;  %s17_s15 = int_to_ptr.vmem [resolvable:$true] %s16_s15 }
   0x5   :  { %s325_s16 = scalar_lea.vmem %s30_s13, 64  ;;  %p330_p1 = scmp.lt.s32.totalorder %s30_s13, %s30_s13 }
   0x6   :  { %p326_p0 = scmp.ne.s32.totalorder %s30_s13, %s325_s16  ;;  %p331_p2 = scmp.lt.s32.totalorder %s325_s16, %s325_s16 }
   0x8   :  { %p332_p3 = por %p331_p2, %p330_p1 }
   0xa   :  { %p333_p4 = pnand %p332_p3, %p326_p0 }
   0xc   :  { %336 = shalt.err (!%p333_p4)
}
   0xd   :  { %32 = dma.hbm_to_vmem [thread:$0]  %s469_s1, 64, %s30_s13, [#allocation6]  }
   0xe   :  { %s345_s19 = scalar_lea.vmem %s17_s15, 64  ;;  %s349_s20 = scalar_lea.vmem %s17_s15, 512 }
   0xf   :  { %p346_p5 = scmp.ne.s32.totalorder %s17_s15, %s345_s19  ;;  %p350_p6 = scmp.lt.s32.totalorder %s17_s15, %s17_s15 }
  0x10   :  { %p351_p7 = scmp.lt.s32.totalorder %s349_s20, %s345_s19 }
  0x12   :  { %p352_p8 = por %p351_p7, %p350_p6 }
  0x14   :  { %p353_p9 = pnand %p352_p8, %p346_p5 }
  0x16   :  { %356 = shalt.err (!%p353_p9)
}
  0x17   :  { %s405_s21 = smov 64   ;;  %s406_s22 = smov 4  }
  0x18   :  { %22 = dma.hbm_to_vmem [thread:$0]  %s468_s0, 64, %s17_s15, [#allocation3], %s405_s21, %s405_s21, %s406_s22  }
  0x19   :  { %s407_s25 = smov [#allocation7]  }
  0x1a   :  { %s39_s26 = sshll.u32 %s407_s25, 4  ;;  %s40_s26 = int_to_ptr.vmem [resolvable:$true] %s39_s26 }
  0x1b   :  { %s365_s1 = scalar_lea.vmem %s40_s26, 64  ;;  %p370_p11 = scmp.lt.s32.totalorder %s40_s26, %s40_s26 }
  0x1c   :  { %p366_p10 = scmp.ne.s32.totalorder %s40_s26, %s365_s1  ;;  %p371_p12 = scmp.lt.s32.totalorder %s365_s1, %s365_s1 }
  0x1e   :  { %p372_p13 = por %p371_p12, %p370_p11 }
  0x20   :  { %p373_p0 = pnand %p372_p13, %p366_p10 }
  0x22   :  { %376 = shalt.err (!%p373_p0)
}
  0x23   :  { %42 = dma.hbm_to_vmem [thread:$0]  %s470_s2, 64, %s40_s26, [#allocation6]  }
  0x24   :  { %397 = dma.done.wait [#allocation3], 512  }
  0x25   :  { %398 = vsyncadd [#allocation3], 4294966784 }
  0x26   :  { %399 = dma.done.wait [#allocation6], 128  }
  0x27   :  { %400 = vsyncadd [#allocation6], 4294967168  ;;  %v62_v0 = vlaneseq  ;;  %v408_v1 = vmov 1966171168   ;;  %v60_v9 = vld [vmem:[#allocation5] sm:$0xf] }
  0x28   :  { %v83_v2 = vunpack.c.l.s4 %v408_v1  ;;  %v162_v11 = vld [vmem:[#allocation7] sm:$0xf]  ;;  %v52_v40 = vld [vmem:[#allocation2] sm:$0xf]  ;;  %v56_v49 = vld [vmem:[#allocation2 + $0x10] sm:$0xf] }
  0x29   :  { %v63_v3 = vshrl.u32 %v62_v0, 7  ;;  %vm442_vm0 = vcmp.lt.s32.totalorder %v62_v0, 512  ;;  %v53_v43 = vld [vmem:[#allocation2 + $0x4] sm:$0xf]  ;;  %v57_v51 = vld [vmem:[#allocation2 + $0x14] sm:$0xf] }
  0x2a   :  { %v84_v4 = vunpack.c.0.s8 %v83_v2  ;;  %v54_v55 = vld [vmem:[#allocation2 + $0x8] sm:$0xf]  ;;  %v55_v56 = vld [vmem:[#allocation2 + $0xc] sm:$0xf] }
  0x2b   :  { %v64_v5 = vsub.s32 0, %v63_v3  ;;  %v68_v6 = vsub.s32 1, %v63_v3  ;;  %v72_v7 = vsub.s32 2, %v63_v3  ;;  %v76_v8 = vsub.s32 3, %v63_v3 }
  0x2c   :  { %v87_v10 = vsub.s32 %v84_v4, %v63_v3 }
  0x2d   :  { %v65_v12 = vrot.slane %v60_v9, %v64_v5  ;;  %v69_v13 = vrot.slane %v60_v9, %v68_v6  ;;  %v73_v14 = vrot.slane %v60_v9, %v72_v7  ;;  %v77_v15 = vrot.slane %v60_v9, %v76_v8 }
  0x2e   :  { %v167_v16 = vrot.slane %v162_v11, %v64_v5  ;;  %v171_v17 = vrot.slane %v162_v11, %v68_v6  ;;  %v175_v18 = vrot.slane %v162_v11, %v72_v7  ;;  %v179_v19 = vrot.slane %v162_v11, %v76_v8  ;;  %v58_v7 = vld [vmem:[#allocation2 + $0x18] sm:$0xf] }
  0x2f   :  { %v78_v20 = vcombine.low %v65_v12, %v69_v13  ;;  %v80_v21 = vcombine.low %v73_v14, %v77_v15  ;;  %v79_v22 = vcombine.high %v65_v12, %v69_v13  ;;  %v81_v23 = vcombine.high %v73_v14, %v77_v15 }
  0x30   :  { %v180_v24 = vcombine.low %v167_v16, %v171_v17  ;;  %v182_v25 = vcombine.low %v175_v18, %v179_v19  ;;  %v181_v26 = vcombine.high %v167_v16, %v171_v17  ;;  %v183_v27 = vcombine.high %v175_v18, %v179_v19  ;;  %v59_v16 = vld [vmem:[#allocation2 + $0x1c] sm:$0xf] }
  0x31   :  { %v88_v28 = vrot.slane %v78_v20, %v87_v10  ;;  %v102_v29 = vrot.slane %v80_v21, %v87_v10  ;;  %v95_v30 = vrot.slane %v79_v22, %v87_v10  ;;  %v109_v31 = vrot.slane %v81_v23, %v87_v10 }
  0x32   :  { %v190_v32 = vrot.slane %v180_v24, %v87_v10  ;;  %v204_v33 = vrot.slane %v182_v25, %v87_v10  ;;  %v197_v34 = vrot.slane %v181_v26, %v87_v10  ;;  %v211_v35 = vrot.slane %v183_v27, %v87_v10 }
  0x33   :  { %v110_v36 = vcombine.low %v88_v28, %v102_v29  ;;  %v111_v37 = vcombine.high %v88_v28, %v102_v29  ;;  %v112_v38 = vcombine.low %v95_v30, %v109_v31  ;;  %v113_v39 = vcombine.high %v95_v30, %v109_v31 }
  0x34   :  { %v212_v41 = vcombine.low %v190_v32, %v204_v33  ;;  %v213_v44 = vcombine.high %v190_v32, %v204_v33  ;;  %v214_v45 = vcombine.low %v197_v34, %v211_v35  ;;  %v215_v46 = vcombine.high %v197_v34, %v211_v35 }
  0x35   :  { %v120_v47 = vrot.slane %v110_v36, %v87_v10  ;;  %v134_v48 = vrot.slane %v111_v37, %v87_v10  ;;  %v127_v50 = vrot.slane %v112_v38, %v87_v10  ;;  %v141_v52 = vrot.slane %v113_v39, %v87_v10 }
  0x36   :  { %v222_v53 = vrot.slane %v212_v41, %v87_v10  ;;  %v236_v54 = vrot.slane %v213_v44, %v87_v10  ;;  %v229_v57 = vrot.slane %v214_v45, %v87_v10  ;;  %v243_v58 = vrot.slane %v215_v46, %v87_v10 }
  0x37   :  { %v154_v59 = vmul.f32 %v120_v47, %v52_v40  ;;  %v155_v60 = vmul.f32 %v134_v48, %v53_v43  ;;  %v142_v61 = vcombine.high %v120_v47, %v120_v47  ;;  %v144_v62 = vcombine.high %v134_v48, %v134_v48 }
  0x38   :  { %v244_v63 = vcombine.high %v222_v53, %v222_v53  ;;  %v246_v0 = vcombine.high %v236_v54, %v236_v54  ;;  %v158_v1 = vmul.f32 %v127_v50, %v56_v49  ;;  %v159_v2 = vmul.f32 %v141_v52, %v57_v51 }
  0x39   :  { %v256_v3 = vadd.f32 %v222_v53, %v154_v59  ;;  %v257_v4 = vadd.f32 %v236_v54, %v155_v60  ;;  %v156_v5 = vmul.f32 %v142_v61, %v54_v55  ;;  %v157_v6 = vmul.f32 %v144_v62, %v55_v56 }
  0x3a   :  { %v260_v8 = vadd.f32 %v229_v57, %v158_v1  ;;  %v261_v9 = vadd.f32 %v243_v58, %v159_v2  ;;  %v143_v11 = vcombine.high %v127_v50, %v127_v50  ;;  %v245_v12 = vcombine.high %v229_v57, %v229_v57 }
  0x3b   :  { %v264_v13 = vmax.f32 %v256_v3, 0.0  ;;  %v265_v14 = vmax.f32 %v257_v4, 0.0  ;;  %v258_v10 = vadd.f32 %v244_v63, %v156_v5  ;;  %v259_v15 = vadd.f32 %v246_v0, %v157_v6 }
  0x3c   :  { %v268_v17 = vmax.f32 %v260_v8, 0.0  ;;  %v269_v18 = vmax.f32 %v261_v9, 0.0  ;;  %v160_v19 = vmul.f32 %v143_v11, %v58_v7  ;;  %v145_v20 = vcombine.high %v141_v52, %v141_v52 }
  0x3d   :  { %v272_v21 = vmin.f32 %v264_v13, 1.0  ;;  %v273_v22 = vmin.f32 %v265_v14, 1.0  ;;  %v266_v23 = vmax.f32 %v258_v10, 0.0  ;;  %v267_v24 = vmax.f32 %v259_v15, 0.0 }
  0x3e   :  { %v276_v25 = vmin.f32 %v268_v17, 1.0  ;;  %v277_v26 = vmin.f32 %v269_v18, 1.0  ;;  %v262_v27 = vadd.f32 %v245_v12, %v160_v19  ;;  %v161_v28 = vmul.f32 %v145_v20, %v59_v16 }
  0x3f   :  { %284 = vst.msk [vmem:[#allocation8] sm:$0xf] %vm442_vm0, %v272_v21  ;;  %285 = vst.msk [vmem:[#allocation8 + $0x4] sm:$0xf] %vm442_vm0, %v273_v22  ;;  %v274_v29 = vmin.f32 %v266_v23, 1.0  ;;  %v275_v30 = vmin.f32 %v267_v24, 1.0  ;;  %v247_v31 = vcombine.high %v243_v58, %v243_v58 }
  0x40   :  { %288 = vst.msk [vmem:[#allocation8 + $0x10] sm:$0xf] %vm442_vm0, %v276_v25  ;;  %289 = vst.msk [vmem:[#allocation8 + $0x14] sm:$0xf] %vm442_vm0, %v277_v26  ;;  %v270_v32 = vmax.f32 %v262_v27, 0.0 }
  0x41   :  { %286 = vst.msk [vmem:[#allocation8 + $0x8] sm:$0xf] %vm442_vm0, %v274_v29  ;;  %287 = vst.msk [vmem:[#allocation8 + $0xc] sm:$0xf] %vm442_vm0, %v275_v30  ;;  %v263_v33 = vadd.f32 %v247_v31, %v161_v28 }
  0x42   :  { %v278_v34 = vmin.f32 %v270_v32, 1.0 }
  0x43   :  { %v271_v35 = vmax.f32 %v263_v33, 0.0 }
  0x44   :  { %290 = vst.msk [vmem:[#allocation8 + $0x18] sm:$0xf] %vm442_vm0, %v278_v34 }
  0x45   :  { %v279_v36 = vmin.f32 %v271_v35, 1.0 }
  0x47   :  { %291 = vst.msk [vmem:[#allocation8 + $0x1c] sm:$0xf] %vm442_vm0, %v279_v36 }
  0x48   :  { %296 = vsyncadd [#allocation4], 448  ;;  %s409_s0 = smov [#allocation8]  }
  0x49   :  { %s297_s2 = sshll.u32 %s409_s0, 4  ;;  %s298_s2 = int_to_ptr.vmem [resolvable:$true] %s297_s2 }
  0x4a   :  { %s377_s29 = scalar_lea.vmem %s298_s2, 64  ;;  %s381_s30 = scalar_lea.vmem %s298_s2, 512 }
  0x4b   :  { %p378_p1 = scmp.ne.s32.totalorder %s298_s2, %s377_s29  ;;  %p382_p2 = scmp.lt.s32.totalorder %s298_s2, %s298_s2 }
  0x4c   :  { %p383_p3 = scmp.lt.s32.totalorder %s381_s30, %s377_s29 }
  0x4e   :  { %p384_p4 = por %p383_p3, %p382_p2 }
  0x50   :  { %p385_p5 = pnand %p384_p4, %p378_p1 }
  0x52   :  { %388 = shalt.err (!%p385_p5)
}
  0x53   :  { %303 = dma.vmem_to_hbm [thread:$0]  %s298_s2, 64, %s471_s3, [#allocation4], %s405_s21, %s405_s21, %s406_s22  }
  0x54   :  { %401 = dma.done.wait [#allocation4], 512  }
  0x55   :  { %402 = vsyncadd [#allocation4], 4294966784 }
  0x56   :  { %307 = vsyncpa [#allocation3], 1 }
  0x57   :  { %308 = vsyncpa [#allocation6], 1 }
  0x58   :  { %309 = vsyncpa [#allocation4], 1 }

</bundles_post_ra>
